<compile_context>
chip_gen: v5e
topology: v5e:2x2
jax: 0.10.0
libtpu: 0.0.40
codegen_flags: <defaults>
</compile_context>

<pallas_src>
import jax
import jax.numpy as jnp
from jax.experimental import pallas as pl
from jax.experimental.pallas import tpu as pltpu

LANE = 128
SUBLANE = 8


def _disc_exp_neg_mod_kernel(x_ref, o_ref):
    # relu(1 - 0.5 * relu(|x|)) == max(0, 1 - 0.5 * |x|); all VPU elementwise.
    x = x_ref[...]
    o_ref[...] = jnp.maximum(1.0 - 0.5 * jnp.abs(x), 0.0).astype(o_ref.dtype)


def disc_exp_neg_mod(x, *, tile_bytes=2 * 1024 * 1024):
    """Compute relu(1 - 0.5*relu(|x|)) with a fused Pallas TPU kernel."""
    orig_shape = x.shape
    n = x.size
    itemsize = jnp.dtype(x.dtype).itemsize

    # Flatten to a lane-dense (rows, 128) slab. Only pad up to the next
    # (8*128)-element boundary (<= 1023 elements) when needed, so the common
    # aligned case (typical NN activation sizes) does zero extra HBM copies.
    block_elems = SUBLANE * LANE
    n_pad = pl.cdiv(n, block_elems) * block_elems
    x_flat = jnp.ravel(x)
    padded = n_pad != n
    if padded:
        x_flat = jnp.pad(x_flat, (0, n_pad - n))
    rows = n_pad // LANE
    x2d = x_flat.reshape(rows, LANE)

    # Tile sized to ~tile_bytes per buffer (default 2 MiB): with input+output
    # double-buffered that's ~8 MiB of VMEM, safe on v5e (16 MiB scoped
    # default), v6e and v7x, while being large enough to sit at HBM roofline.
    tile_rows = (tile_bytes // (LANE * itemsize)) // SUBLANE * SUBLANE
    tile_rows = max(SUBLANE, min(tile_rows, rows))
    grid = (pl.cdiv(rows, tile_rows),)

    out2d = pl.pallas_call(
        _disc_exp_neg_mod_kernel,
        out_shape=jax.ShapeDtypeStruct((rows, LANE), x.dtype),
        grid_spec=pltpu.PrefetchScalarGridSpec(
            num_scalar_prefetch=0,
            grid=grid,
            in_specs=[pl.BlockSpec((tile_rows, LANE), lambda i: (i, 0))],
            out_specs=pl.BlockSpec((tile_rows, LANE), lambda i: (i, 0)),
        ),
        compiler_params=pltpu.CompilerParams(
            dimension_semantics=("parallel",),
        ),
        cost_estimate=pl.CostEstimate(
            flops=3 * n,
            transcendentals=0,
            bytes_accessed=2 * n * itemsize,
        ),
    )(x2d)

    if padded:
        # Only the rare unaligned case pays for the slice copy.
        return out2d.reshape(-1)[:n].reshape(orig_shape)
    return out2d.reshape(orig_shape)


def _reference(x):
    return jax.nn.relu(1.0 - 0.5 * jax.nn.relu(jnp.abs(x)))


if __name__ == "__main__":
    key = jax.random.PRNGKey(0)

    # Small NCHW-style activation input (aligned path: 2*4*16*16 = 2048 elems).
    x = jax.random.normal(key, (2, 4, 16, 16), dtype=jnp.float32) * 3.0
    y = disc_exp_neg_mod(x)
    jax.block_until_ready(y)
    assert y.shape == x.shape and y.dtype == x.dtype
    assert jnp.allclose(y, _reference(x), atol=1e-6), "mismatch (aligned case)"

    # Unaligned shape to exercise the minimal-padding path (105 elements).
    x2 = jax.random.normal(jax.random.PRNGKey(1), (3, 5, 7), dtype=jnp.float32) * 3.0
    y2 = disc_exp_neg_mod(x2)
    jax.block_until_ready(y2)
    assert y2.shape == x2.shape and y2.dtype == x2.dtype
    assert jnp.allclose(y2, _reference(x2), atol=1e-6), "mismatch (padded case)"

    print("KERNEL_OK")
</pallas_src>

<mosaic_0001>
module attributes {stable_mosaic.version = 11 : i64} {
  func.func @_disc_exp_neg_mod_kernel(%arg0: i32, %arg1: memref<16x128xf32, #tpu.memory_space<vmem>>, %arg2: memref<16x128xf32, #tpu.memory_space<vmem>>) attributes {dimension_semantics = [#tpu.dimension_semantics<parallel>], iteration_bounds = array<i64: 1>, scalar_prefetch = 0 : i64, scratch_operands = 0 : i64, tpu.core_type = #tpu.core_type<tc>, window_params = [{transform_indices = @transform_0, window_bounds = array<i64: 16, 128>}, {transform_indices = @transform_1, window_bounds = array<i64: 16, 128>}]} {
    %c0 = arith.constant 0 : index
    %c0_0 = arith.constant 0 : index
    %0 = vector.load %arg1[%c0, %c0_0] : memref<16x128xf32, #tpu.memory_space<vmem>>, vector<16x128xf32>
    %1 = math.absf %0 : vector<16x128xf32>
    %cst = arith.constant 5.000000e-01 : f32
    %2 = vector.broadcast %cst : f32 to vector<16x128xf32>
    %3 = arith.mulf %2, %1 : vector<16x128xf32>
    %cst_1 = arith.constant 1.000000e+00 : f32
    %4 = vector.broadcast %cst_1 : f32 to vector<16x128xf32>
    %5 = arith.subf %4, %3 : vector<16x128xf32>
    %cst_2 = arith.constant 0.000000e+00 : f32
    %6 = vector.broadcast %cst_2 : f32 to vector<16x128xf32>
    %7 = arith.maximumf %5, %6 : vector<16x128xf32>
    %c0_3 = arith.constant 0 : index
    %c0_4 = arith.constant 0 : index
    %8 = vector.load %arg2[%c0_3, %c0_4] : memref<16x128xf32, #tpu.memory_space<vmem>>, vector<16x128xf32>
    tpu.vector_store %arg2[%c0_3, %c0_4], %7 {strides = array<i32>} : memref<16x128xf32, #tpu.memory_space<vmem>>, vector<16x128xf32>,
    return
  }
  func.func @transform_0(%arg0: i32) -> (i32, i32) {
    %c0_i32 = arith.constant 0 : i32
    %c0_i32_0 = arith.constant 0 : i32
    return %arg0, %c0_i32 : i32, i32
  }
  func.func @transform_1(%arg0: i32) -> (i32, i32) {
    %c0_i32 = arith.constant 0 : i32
    %c0_i32_0 = arith.constant 0 : i32
    return %arg0, %c0_i32 : i32, i32
  }
}

</mosaic_0001>

<bundles_post_ra>
// kernel: tpu_custom_call.1
= control target key start
LH: loop header
LB: loop body
LE: loop exit
PB: predicated region body
PF: predicated region fallthrough
CT: control target
= control target key end

     0   :  { %6 = vsyncpa [#allocation3], 0  ;;  %s132_s0 = inlined_call_operand.hbm [shape: f32[16,128], index: 0, kind: input, shape index: {}]   ;;  %s133_s1 = inlined_call_operand.hbm [shape: f32[16,128], index: 1, kind: output, shape index: {}]  }
   0x1   :  { %7 = vsyncpa [#allocation4], 0  ;;  %s12_s8 = sshll.u32 %s132_s0, 4  ;;  %s112_s9 = smov [#allocation2]   ;;  %s13_s8 = int_to_ptr.hbm [resolvable:$true] %s12_s8 }
   0x2   :  { %s14_s10 = sshll.u32 %s112_s9, 4  ;;  %s113_s11 = smov 128   ;;  %s15_s10 = int_to_ptr.vmem [resolvable:$true] %s14_s10 }
   0x3   :  { %s114_s12 = smov 8  }
   0x4   :  { %20 = dma.hbm_to_vmem [thread:$0]  %s13_s8, 256, %s15_s10, [#allocation3], %s113_s11, %s113_s11, %s114_s12  }
   0x5   :  { %108 = dma.done.wait [#allocation3], 256  }
   0x6   :  { %109 = vsyncadd [#allocation3], 4294967040  ;;  %v25_v0 = vld [vmem:[#allocation2] sm:$0xff]  ;;  %v26_v1 = vld [vmem:[#allocation2 + $0x8] sm:$0xff]  ;;  %s115_s13 = smov [#allocation5]   ;;  %s43_s16 = sshll.u32 %s133_s1, 4  ;;  %s44_s16 = int_to_ptr.hbm [resolvable:$true] %s43_s16 }
   0x7   :  { %v27_v2 = vand.u32 2147483647, %v25_v0  ;;  %v28_v3 = vand.u32 2147483647, %v26_v1  ;;  %s41_s14 = sshll.u32 %s115_s13, 4  ;;  %s42_s14 = int_to_ptr.vmem [resolvable:$true] %s41_s14 }
   0x9   :  { %v29_v4 = vmul.f32 0.5, %v27_v2  ;;  %v30_v5 = vmul.f32 0.5, %v28_v3 }
   0xb   :  { %v31_v6 = vsub.f32 1.0, %v29_v4  ;;  %v32_v7 = vsub.f32 1.0, %v30_v5 }
   0xd   :  { %v33_v8 = vmax.f32 %v31_v6, 0.0  ;;  %v34_v9 = vmax.f32 %v32_v7, 0.0 }
   0xf   :  { %35 = vst [vmem:[#allocation5] sm:$0xff] %v33_v8 }
  0x10   :  { %36 = vst [vmem:[#allocation5 + $0x8] sm:$0xff] %v34_v9 }
  0x11   :  { %49 = dma.vmem_to_hbm [thread:$0]  %s42_s14, 256, %s44_s16, [#allocation4], %s113_s11, %s113_s11, %s114_s12  }
  0x12   :  { %110 = dma.done.wait [#allocation4], 256  }
  0x13   :  { %111 = vsyncadd [#allocation4], 4294967040 }
  0x14   :  { %54 = vsyncpa [#allocation3], 1 }
  0x15   :  { %55 = vsyncpa [#allocation4], 1 }

</bundles_post_ra>
